<compile_context>
chip_gen: v5e
topology: v5e:2x2
jax: 0.10.0
libtpu: 0.0.40
codegen_flags: <defaults>
</compile_context>

<pallas_src>
import functools
import math

import jax
import jax.numpy as jnp
import numpy as np
from jax.experimental import pallas as pl
from jax.experimental.pallas import tpu as pltpu

EPS = 1e-5


def _round_up(a, b):
    return (a + b - 1) // b * b


# ----------------------------- Pallas kernel --------------------------------
def resincept_kernel(x_ref, w1_ref, b1_ref, w2_ref, t2_ref, o_ref, *,
                     nb, C_in_pad, C_out_pad, L, padmax, T):
    H = nb * C_in_pad
    x = x_ref[...]                                             # (C_in_pad, T)

    # ---- fused 1x1 convs: [branch pre-convs ; residual], BN/bias folded ----
    f = jnp.dot(w1_ref[...], x, preferred_element_type=jnp.float32) + b1_ref[...]
    h = jnp.maximum(f[0:H, :], 0.0)                            # (H, T) f32
    r = f[H:, :]                                               # (C_out_pad, T) f32

    # lane position within its sample (tiles are sample-aligned: T % L == 0)
    pos = jax.lax.broadcasted_iota(jnp.int32, (H, T), 1) % L

    # ---- spatial convs of all branches: accumulate over tap offsets --------
    # w2_ref[d+padmax] holds every branch's tap weights for offset d, placed in
    # their final concatenated output rows (zero for branches without that
    # tap), so the accumulator is directly the channel-concatenated output.
    acc = jnp.broadcast_to(t2_ref[...], (C_out_pad, T))        # folded conv biases
    for d in range(-padmax, padmax + 1):                       # static unroll
        if d == 0:
            win = h
        else:
            # win[:, j] = h[:, j + d]  (XLU rotate; wraparound lanes are masked)
            win = pltpu.roll(h, shift=(-d) % T, axis=1)
            valid = jnp.logical_and(pos + d >= 0, pos + d < L)
            win = jnp.where(valid, win, 0.0)
        acc = acc + jnp.dot(w2_ref[d + padmax], win.astype(w2_ref.dtype),
                            preferred_element_type=jnp.float32)

    y = jnp.maximum(acc, 0.0)                                  # per-branch ReLU
    o_ref[...] = jnp.maximum(y + r, 0.0)                       # + residual, final ReLU


# --------------------------- tiling / wrapper --------------------------------
def _choose_lane_tile(NL_pad, unit, per_lane_bytes, budget_bytes):
    """Largest lane tile (multiple of `unit`, divisor of NL_pad) under the VMEM
    budget; if the whole axis fits and there are >=2 units, split so both v7x
    TensorCores get work (as long as tiles stay reasonably lane-dense)."""
    m = NL_pad // unit
    divs = [q for q in range(1, m + 1) if m % q == 0]
    fit = [q for q in divs if q * unit * per_lane_bytes <= budget_bytes] or [1]
    q = max(fit)
    if q == m and m >= 2:
        smaller = [d for d in fit if d < m]
        if smaller and max(smaller) * unit >= 512:
            q = max(smaller)
    return q * unit


def residual_inception_block_pallas(x, fp, *, vmem_budget_bytes=8 << 20):
    """x: (N, C_in, L) float32.  fp: folded/stacked params from fold_params()."""
    N, C_in, L = x.shape
    kernel_sizes = fp["kernel_sizes"]
    nb = len(kernel_sizes)
    C_in_pad, C_out_pad, C_out = fp["C_in_pad"], fp["C_out_pad"], fp["C_out"]
    padmax = fp["padmax"]
    compute_dtype = fp["w1"].dtype
    itemsize = jnp.dtype(compute_dtype).itemsize

    NL = N * L
    unit = L * 128 // math.gcd(L, 128)          # lcm(L,128): sample- and lane-aligned
    NL_pad = _round_up(NL, unit)                # lane-dense, unmasked output stores

    # VMEM-budget-derived lane tile: double-buffered x/out tiles + live temps.
    per_lane = (2 * C_in_pad * itemsize + 2 * C_out_pad * 4
                + nb * C_in_pad * (3 * 4 + 2 * itemsize)
                + 3 * C_out_pad * 4)
    per_lane = int(per_lane * 1.5) + 1          # headroom for compiler temps
    T = _choose_lane_tile(NL_pad, unit, per_lane, vmem_budget_bytes)
    assert T % L == 0 and T % 128 == 0 and NL_pad % T == 0

    # pack (N, C, L) -> (C, N*L); zero-pad channels + lanes to aligned shapes
    xp = jnp.reshape(jnp.transpose(x, (1, 0, 2)), (C_in, NL))
    xp = jnp.pad(xp, ((0, C_in_pad - C_in), (0, NL_pad - NL))).astype(compute_dtype)

    kern = functools.partial(
        resincept_kernel, nb=nb, C_in_pad=C_in_pad, C_out_pad=C_out_pad,
        L=L, padmax=padmax, T=T)

    out = pl.pallas_call(
        kern,
        out_shape=jax.ShapeDtypeStruct((C_out_pad, NL_pad), jnp.float32),
        grid_spec=pltpu.PrefetchScalarGridSpec(
            num_scalar_prefetch=0,
            grid=(NL_pad // T,),
            in_specs=[
                pl.BlockSpec((C_in_pad, T), lambda i: (0, i)),     # x lane tile
                pl.BlockSpec(fp["w1"].shape, lambda i: (0, 0)),    # fused 1x1 weights
                pl.BlockSpec(fp["b1"].shape, lambda i: (0, 0)),    # fused 1x1 biases
                pl.BlockSpec(fp["w2"].shape, lambda i: (0, 0, 0)),  # per-offset tap weights
                pl.BlockSpec(fp["t2"].shape, lambda i: (0, 0)),    # folded conv biases
            ],
            out_specs=pl.BlockSpec((C_out_pad, T), lambda i: (0, i)),
        ),
        compiler_params=pltpu.CompilerParams(
            dimension_semantics=("parallel",),
        ),
    )(xp, fp["w1"], fp["b1"], fp["w2"], fp["t2"])

    out = out[:C_out, :NL]                       # drop row/lane padding
    return jnp.transpose(jnp.reshape(out, (C_out, N, L)), (1, 0, 2))


# --------------------------- parameter handling ------------------------------
def init_raw_params(C_in, C_out, kernel_sizes):
    branch_out = C_out // len(kernel_sizes)
    key = jax.random.PRNGKey(42)
    raw = {"branches": []}
    for i, k in enumerate(kernel_sizes):
        keys = jax.random.split(jax.random.fold_in(key, i), 4)
        w1 = 0.3 * jax.random.normal(keys[0], (C_in, C_in, 1), jnp.float32)
        b1 = 0.1 * jax.random.normal(keys[1], (C_in,), jnp.float32)
        w2 = 0.3 * jax.random.normal(keys[2], (branch_out, C_in, k), jnp.float32)
        b2 = 0.1 * jax.random.normal(keys[3], (branch_out,), jnp.float32)
        bn1 = (1.0 + 0.1 * jnp.arange(C_in, dtype=jnp.float32),     # gamma
               0.05 * jnp.arange(C_in, dtype=jnp.float32),          # beta
               0.02 * jnp.arange(C_in, dtype=jnp.float32),          # running_mean
               1.0 + 0.05 * jnp.arange(C_in, dtype=jnp.float32))    # running_var
        bn2 = (1.0 + 0.1 * jnp.arange(branch_out, dtype=jnp.float32),
               0.05 * jnp.arange(branch_out, dtype=jnp.float32),
               0.02 * jnp.arange(branch_out, dtype=jnp.float32),
               1.0 + 0.05 * jnp.arange(branch_out, dtype=jnp.float32))
        raw["branches"].append(
            dict(k=k, w1=w1, b1=b1, bn1=bn1, w2=w2, b2=b2, bn2=bn2))
    if C_in != C_out:
        raw["wr"] = 0.3 * jax.random.normal(jax.random.fold_in(key, 100),
                                            (C_out, C_in, 1), jnp.float32)
        raw["br"] = 0.1 * jax.random.normal(jax.random.fold_in(key, 101),
                                            (C_out,), jnp.float32)
    return raw


def fold_params(raw, C_in, C_out, compute_dtype=jnp.float32):
    """Fold eval-mode BN + conv biases into weights; stack + sublane-pad for the
    fused kernel.  compute_dtype=bf16 enables the v6e/v7x MXU fast path."""
    kernel_sizes = tuple(bp["k"] for bp in raw["branches"])
    assert all(k % 2 == 1 for k in kernel_sizes), "odd kernel sizes required"
    nb = len(kernel_sizes)
    assert C_out % nb == 0
    bo = C_out // nb
    g = 8 if jnp.dtype(compute_dtype).itemsize == 4 else 16     # sublane granule
    C_in_pad = _round_up(C_in, g)
    C_out_pad = _round_up(C_out, g)
    padmax = max(kernel_sizes) // 2
    ntaps = 2 * padmax + 1
    H = nb * C_in_pad

    W1 = np.zeros((H + C_out_pad, C_in_pad), np.float32)
    B1 = np.zeros((H + C_out_pad, 1), np.float32)
    W2 = np.zeros((ntaps, C_out_pad, H), np.float32)
    T2 = np.zeros((C_out_pad, 1), np.float32)

    for b, bp in enumerate(raw["branches"]):
        k = bp["k"]
        pad = k // 2
        g1, be1, m1, v1 = [np.asarray(a) for a in bp["bn1"]]
        s1 = g1 / np.sqrt(v1 + EPS)
        W1[b * C_in_pad:b * C_in_pad + C_in, :C_in] = s1[:, None] * np.asarray(bp["w1"])[:, :, 0]
        B1[b * C_in_pad:b * C_in_pad + C_in, 0] = s1 * (np.asarray(bp["b1"]) - m1) + be1

        g2, be2, m2, v2 = [np.asarray(a) for a in bp["bn2"]]
        s2 = g2 / np.sqrt(v2 + EPS)
        w2s = s2[:, None, None] * np.asarray(bp["w2"])          # (bo, C_in, k)
        for t in range(k):
            d = t - pad
            W2[d + padmax, b * bo:(b + 1) * bo,
               b * C_in_pad:b * C_in_pad + C_in] = w2s[:, :, t]
        T2[b * bo:(b + 1) * bo, 0] = s2 * (np.asarray(bp["b2"]) - m2) + be2

    if raw.get("wr") is None:                   # residual_adjust == nn.Identity()
        wr = np.eye(C_in, dtype=np.float32)
        br = np.zeros((C_out,), np.float32)
    else:
        wr = np.asarray(raw["wr"])[:, :, 0]
        br = np.asarray(raw["br"])
    W1[H:H + C_out, :C_in] = wr
    B1[H:H + C_out, 0] = br

    return {
        "kernel_sizes": kernel_sizes,
        "C_out": C_out,
        "C_in_pad": C_in_pad,
        "C_out_pad": C_out_pad,
        "padmax": padmax,
        "w1": jnp.asarray(W1, compute_dtype),   # (nb*C_in_pad + C_out_pad, C_in_pad)
        "b1": jnp.asarray(B1, jnp.float32),     # f32 bias added after f32-accum dot
        "w2": jnp.asarray(W2, compute_dtype),   # (ntaps, C_out_pad, nb*C_in_pad)
        "t2": jnp.asarray(T2, jnp.float32),
    }


# --------------------------- pure-JAX reference ------------------------------
def ref_forward(x, raw):
    def conv1d(x, w, b, pad):
        y = jax.lax.conv_general_dilated(
            x, w, window_strides=(1,), padding=[(pad, pad)],
            dimension_numbers=("NCH", "OIH", "NCH"))
        return y + b[None, :, None]

    def bn(x, gamma, beta, mean, var):
        return (gamma[None, :, None] * (x - mean[None, :, None])
                / jnp.sqrt(var[None, :, None] + EPS) + beta[None, :, None])

    outs = []
    for bp in raw["branches"]:
        h = conv1d(x, bp["w1"], bp["b1"], 0)
        h = jax.nn.relu(bn(h, *bp["bn1"]))
        h = conv1d(h, bp["w2"], bp["b2"], bp["k"] // 2)
        h = jax.nn.relu(bn(h, *bp["bn2"]))
        outs.append(h)
    cat = jnp.concatenate(outs, axis=1)
    res = x if raw.get("wr") is None else conv1d(x, raw["wr"], raw["br"], 0)
    return jax.nn.relu(cat + res)


# --------------------------------- main --------------------------------------
if __name__ == "__main__":
    N, C_in, C_out, L = 2, 4, 8, 16
    kernel_sizes = (3, 5)

    x = jax.random.normal(jax.random.PRNGKey(0), (N, C_in, L), jnp.float32)
    raw = init_raw_params(C_in, C_out, kernel_sizes)
    ref = jax.block_until_ready(ref_forward(x, raw))

    # f32 path: matches the module's f32 semantics to 1e-3
    fp32 = fold_params(raw, C_in, C_out, compute_dtype=jnp.float32)
    out32 = jax.block_until_ready(residual_inception_block_pallas(x, fp32))
    np.testing.assert_allclose(np.asarray(out32), np.asarray(ref),
                               rtol=1e-3, atol=1e-3)

    # bf16 matmul path (v6e/v7x MXU fast path): bf16 weights/x, f32 accumulation
    fp16 = fold_params(raw, C_in, C_out, compute_dtype=jnp.bfloat16)
    out16 = jax.block_until_ready(residual_inception_block_pallas(x, fp16))
    np.testing.assert_allclose(np.asarray(out16), np.asarray(ref),
                               rtol=5e-2, atol=5e-2)

    print("KERNEL_OK")
</pallas_src>

<mosaic_0001>
module attributes {stable_mosaic.version = 11 : i64} {
  func.func @resincept_kernel(%arg0: i32, %arg1: memref<8x128xf32, #tpu.memory_space<vmem>>, %arg2: memref<24x8xf32, #tpu.memory_space<vmem>>, %arg3: memref<24x1xf32, #tpu.memory_space<vmem>>, %arg4: memref<5x8x16xf32, #tpu.memory_space<vmem>>, %arg5: memref<8x1xf32, #tpu.memory_space<vmem>>, %arg6: memref<8x128xf32, #tpu.memory_space<vmem>>) attributes {dimension_semantics = [#tpu.dimension_semantics<parallel>], iteration_bounds = array<i64: 1>, scalar_prefetch = 0 : i64, scratch_operands = 0 : i64, tpu.core_type = #tpu.core_type<tc>, window_params = [{transform_indices = @transform_0, window_bounds = array<i64: 8, 128>}, {pipeline_mode = #tpu.pipeline_mode<synchronous>, transform_indices = @transform_1, window_bounds = array<i64: 24, 8>}, {pipeline_mode = #tpu.pipeline_mode<synchronous>, transform_indices = @transform_2, window_bounds = array<i64: 24, 1>}, {pipeline_mode = #tpu.pipeline_mode<synchronous>, transform_indices = @transform_3, window_bounds = array<i64: 5, 8, 16>}, {pipeline_mode = #tpu.pipeline_mode<synchronous>, transform_indices = @transform_4, window_bounds = array<i64: 8, 1>}, {transform_indices = @transform_5, window_bounds = array<i64: 8, 128>}]} {
    %c0 = arith.constant 0 : index
    %c0_0 = arith.constant 0 : index
    %0 = vector.load %arg1[%c0, %c0_0] : memref<8x128xf32, #tpu.memory_space<vmem>>, vector<8x128xf32>
    %c0_1 = arith.constant 0 : index
    %c0_2 = arith.constant 0 : index
    %1 = vector.load %arg2[%c0_1, %c0_2] : memref<24x8xf32, #tpu.memory_space<vmem>>, vector<24x8xf32>
    %cst = arith.constant dense<0.000000e+00> : vector<24x128xf32>
    %2 = tpu.matmul %1, %0, %cst {dimension_numbers = #tpu.dot_dimension_numbers<[1], [0], [0], [1], [0, 0, 1, 1], [], []>} : vector<24x8xf32>, vector<8x128xf32>, vector<24x128xf32> -> vector<24x128xf32>
    %c0_3 = arith.constant 0 : index
    %c0_4 = arith.constant 0 : index
    %3 = vector.load %arg3[%c0_3, %c0_4] : memref<24x1xf32, #tpu.memory_space<vmem>>, vector<24x1xf32>
    %4 = vector.broadcast %3 : vector<24x1xf32> to vector<24x128xf32>
    %5 = arith.addf %2, %4 : vector<24x128xf32>
    %6 = vector.extract_strided_slice %5 {offsets = [0, 0], sizes = [16, 128], strides = [1, 1]} : vector<24x128xf32> to vector<16x128xf32>
    %cst_5 = arith.constant 0.000000e+00 : f32
    %7 = vector.broadcast %cst_5 : f32 to vector<16x128xf32>
    %8 = arith.maximumf %6, %7 : vector<16x128xf32>
    %9 = vector.extract_strided_slice %5 {offsets = [16, 0], sizes = [8, 128], strides = [1, 1]} : vector<24x128xf32> to vector<8x128xf32>
    %10 = tpu.iota {dimensions = array<i32: 1>} : vector<16x128xi32>
    %c16_i32 = arith.constant 16 : i32
    %c0_i32 = arith.constant 0 : i32
    %11 = arith.cmpi eq, %c16_i32, %c0_i32 : i32
    %c1_i32 = arith.constant 1 : i32
    %12 = arith.select %11, %c1_i32, %c16_i32 : i32
    %13 = vector.broadcast %12 : i32 to vector<16x128xi32>
    %14 = arith.remsi %10, %13 : vector<16x128xi32>
    %c0_i32_6 = arith.constant 0 : i32
    %15 = vector.broadcast %c0_i32_6 : i32 to vector<16x128xi32>
    %16 = arith.cmpi ne, %14, %15 : vector<16x128xi32>
    %c0_i32_7 = arith.constant 0 : i32
    %17 = vector.broadcast %c0_i32_7 : i32 to vector<16x128xi32>
    %18 = arith.cmpi slt, %14, %17 : vector<16x128xi32>
    %c0_i32_8 = arith.constant 0 : i32
    %19 = arith.cmpi slt, %12, %c0_i32_8 : i32
    %20 = vector.broadcast %19 : i1 to vector<16x128xi1>
    %21 = vector.broadcast %20 : vector<16x128xi1> to vector<16x128xi1>
    %22 = arith.xori %18, %21 : vector<16x128xi1>
    %23 = arith.andi %22, %16 : vector<16x128xi1>
    %24 = vector.broadcast %12 : i32 to vector<16x128xi32>
    %25 = arith.addi %14, %24 : vector<16x128xi32>
    %26 = arith.select %23, %25, %14 : vector<16x128xi1>, vector<16x128xi32>
    %c0_9 = arith.constant 0 : index
    %c0_10 = arith.constant 0 : index
    %27 = vector.load %arg5[%c0_9, %c0_10] : memref<8x1xf32, #tpu.memory_space<vmem>>, vector<8x1xf32>
    %28 = vector.shape_cast %27 : vector<8x1xf32> to vector<8x1xf32>
    %29 = vector.broadcast %28 : vector<8x1xf32> to vector<8x128xf32>
    %c2_i32 = arith.constant 2 : i32
    %30 = tpu.dynamic_rotate %8 by %c2_i32 dim 1 : vector<16x128xf32>, i32 -> vector<16x128xf32>
    %c-2_i32 = arith.constant -2 : i32
    %31 = vector.broadcast %c-2_i32 : i32 to vector<16x128xi32>
    %32 = arith.addi %26, %31 : vector<16x128xi32>
    %c0_i32_11 = arith.constant 0 : i32
    %33 = vector.broadcast %c0_i32_11 : i32 to vector<16x128xi32>
    %34 = arith.cmpi sge, %32, %33 : vector<16x128xi32>
    %c-2_i32_12 = arith.constant -2 : i32
    %35 = vector.broadcast %c-2_i32_12 : i32 to vector<16x128xi32>
    %36 = arith.addi %26, %35 : vector<16x128xi32>
    %c16_i32_13 = arith.constant 16 : i32
    %37 = vector.broadcast %c16_i32_13 : i32 to vector<16x128xi32>
    %38 = arith.cmpi slt, %36, %37 : vector<16x128xi32>
    %39 = arith.andi %34, %38 : vector<16x128xi1>
    %cst_14 = arith.constant 0.000000e+00 : f32
    %40 = vector.broadcast %cst_14 : f32 to vector<16x128xf32>
    %41 = arith.select %39, %30, %40 : vector<16x128xi1>, vector<16x128xf32>
    %c0_15 = arith.constant 0 : index
    %c0_16 = arith.constant 0 : index
    %c0_17 = arith.constant 0 : index
    %42 = vector.load %arg4[%c0_15, %c0_16, %c0_17] : memref<5x8x16xf32, #tpu.memory_space<vmem>>, vector<1x8x16xf32>
    %43 = vector.shape_cast %42 : vector<1x8x16xf32> to vector<8x16xf32>
    %cst_18 = arith.constant dense<0.000000e+00> : vector<8x128xf32>
    %44 = tpu.matmul %43, %41, %cst_18 {dimension_numbers = #tpu.dot_dimension_numbers<[1], [0], [0], [1], [0, 0, 1, 1], [], []>} : vector<8x16xf32>, vector<16x128xf32>, vector<8x128xf32> -> vector<8x128xf32>
    %45 = arith.addf %29, %44 : vector<8x128xf32>
    %c1_i32_19 = arith.constant 1 : i32
    %46 = tpu.dynamic_rotate %8 by %c1_i32_19 dim 1 : vector<16x128xf32>, i32 -> vector<16x128xf32>
    %c-1_i32 = arith.constant -1 : i32
    %47 = vector.broadcast %c-1_i32 : i32 to vector<16x128xi32>
    %48 = arith.addi %26, %47 : vector<16x128xi32>
    %c0_i32_20 = arith.constant 0 : i32
    %49 = vector.broadcast %c0_i32_20 : i32 to vector<16x128xi32>
    %50 = arith.cmpi sge, %48, %49 : vector<16x128xi32>
    %c-1_i32_21 = arith.constant -1 : i32
    %51 = vector.broadcast %c-1_i32_21 : i32 to vector<16x128xi32>
    %52 = arith.addi %26, %51 : vector<16x128xi32>
    %c16_i32_22 = arith.constant 16 : i32
    %53 = vector.broadcast %c16_i32_22 : i32 to vector<16x128xi32>
    %54 = arith.cmpi slt, %52, %53 : vector<16x128xi32>
    %55 = arith.andi %50, %54 : vector<16x128xi1>
    %cst_23 = arith.constant 0.000000e+00 : f32
    %56 = vector.broadcast %cst_23 : f32 to vector<16x128xf32>
    %57 = arith.select %55, %46, %56 : vector<16x128xi1>, vector<16x128xf32>
    %c1 = arith.constant 1 : index
    %c0_24 = arith.constant 0 : index
    %c0_25 = arith.constant 0 : index
    %58 = vector.load %arg4[%c1, %c0_24, %c0_25] : memref<5x8x16xf32, #tpu.memory_space<vmem>>, vector<1x8x16xf32>
    %59 = vector.shape_cast %58 : vector<1x8x16xf32> to vector<8x16xf32>
    %cst_26 = arith.constant dense<0.000000e+00> : vector<8x128xf32>
    %60 = tpu.matmul %59, %57, %cst_26 {dimension_numbers = #tpu.dot_dimension_numbers<[1], [0], [0], [1], [0, 0, 1, 1], [], []>} : vector<8x16xf32>, vector<16x128xf32>, vector<8x128xf32> -> vector<8x128xf32>
    %61 = arith.addf %45, %60 : vector<8x128xf32>
    %c2 = arith.constant 2 : index
    %c0_27 = arith.constant 0 : index
    %c0_28 = arith.constant 0 : index
    %62 = vector.load %arg4[%c2, %c0_27, %c0_28] : memref<5x8x16xf32, #tpu.memory_space<vmem>>, vector<1x8x16xf32>
    %63 = vector.shape_cast %62 : vector<1x8x16xf32> to vector<8x16xf32>
    %cst_29 = arith.constant dense<0.000000e+00> : vector<8x128xf32>
    %64 = tpu.matmul %63, %8, %cst_29 {dimension_numbers = #tpu.dot_dimension_numbers<[1], [0], [0], [1], [0, 0, 1, 1], [], []>} : vector<8x16xf32>, vector<16x128xf32>, vector<8x128xf32> -> vector<8x128xf32>
    %65 = arith.addf %61, %64 : vector<8x128xf32>
    %c127_i32 = arith.constant 127 : i32
    %66 = tpu.dynamic_rotate %8 by %c127_i32 dim 1 : vector<16x128xf32>, i32 -> vector<16x128xf32>
    %c1_i32_30 = arith.constant 1 : i32
    %67 = vector.broadcast %c1_i32_30 : i32 to vector<16x128xi32>
    %68 = arith.addi %26, %67 : vector<16x128xi32>
    %c0_i32_31 = arith.constant 0 : i32
    %69 = vector.broadcast %c0_i32_31 : i32 to vector<16x128xi32>
    %70 = arith.cmpi sge, %68, %69 : vector<16x128xi32>
    %c1_i32_32 = arith.constant 1 : i32
    %71 = vector.broadcast %c1_i32_32 : i32 to vector<16x128xi32>
    %72 = arith.addi %26, %71 : vector<16x128xi32>
    %c16_i32_33 = arith.constant 16 : i32
    %73 = vector.broadcast %c16_i32_33 : i32 to vector<16x128xi32>
    %74 = arith.cmpi slt, %72, %73 : vector<16x128xi32>
    %75 = arith.andi %70, %74 : vector<16x128xi1>
    %cst_34 = arith.constant 0.000000e+00 : f32
    %76 = vector.broadcast %cst_34 : f32 to vector<16x128xf32>
    %77 = arith.select %75, %66, %76 : vector<16x128xi1>, vector<16x128xf32>
    %c3 = arith.constant 3 : index
    %c0_35 = arith.constant 0 : index
    %c0_36 = arith.constant 0 : index
    %78 = vector.load %arg4[%c3, %c0_35, %c0_36] : memref<5x8x16xf32, #tpu.memory_space<vmem>>, vector<1x8x16xf32>
    %79 = vector.shape_cast %78 : vector<1x8x16xf32> to vector<8x16xf32>
    %cst_37 = arith.constant dense<0.000000e+00> : vector<8x128xf32>
    %80 = tpu.matmul %79, %77, %cst_37 {dimension_numbers = #tpu.dot_dimension_numbers<[1], [0], [0], [1], [0, 0, 1, 1], [], []>} : vector<8x16xf32>, vector<16x128xf32>, vector<8x128xf32> -> vector<8x128xf32>
    %81 = arith.addf %65, %80 : vector<8x128xf32>
    %c126_i32 = arith.constant 126 : i32
    %82 = tpu.dynamic_rotate %8 by %c126_i32 dim 1 : vector<16x128xf32>, i32 -> vector<16x128xf32>
    %c2_i32_38 = arith.constant 2 : i32
    %83 = vector.broadcast %c2_i32_38 : i32 to vector<16x128xi32>
    %84 = arith.addi %26, %83 : vector<16x128xi32>
    %c0_i32_39 = arith.constant 0 : i32
    %85 = vector.broadcast %c0_i32_39 : i32 to vector<16x128xi32>
    %86 = arith.cmpi sge, %84, %85 : vector<16x128xi32>
    %c2_i32_40 = arith.constant 2 : i32
    %87 = vector.broadcast %c2_i32_40 : i32 to vector<16x128xi32>
    %88 = arith.addi %26, %87 : vector<16x128xi32>
    %c16_i32_41 = arith.constant 16 : i32
    %89 = vector.broadcast %c16_i32_41 : i32 to vector<16x128xi32>
    %90 = arith.cmpi slt, %88, %89 : vector<16x128xi32>
    %91 = arith.andi %86, %90 : vector<16x128xi1>
    %cst_42 = arith.constant 0.000000e+00 : f32
    %92 = vector.broadcast %cst_42 : f32 to vector<16x128xf32>
    %93 = arith.select %91, %82, %92 : vector<16x128xi1>, vector<16x128xf32>
    %c4 = arith.constant 4 : index
    %c0_43 = arith.constant 0 : index
    %c0_44 = arith.constant 0 : index
    %94 = vector.load %arg4[%c4, %c0_43, %c0_44] : memref<5x8x16xf32, #tpu.memory_space<vmem>>, vector<1x8x16xf32>
    %95 = vector.shape_cast %94 : vector<1x8x16xf32> to vector<8x16xf32>
    %cst_45 = arith.constant dense<0.000000e+00> : vector<8x128xf32>
    %96 = tpu.matmul %95, %93, %cst_45 {dimension_numbers = #tpu.dot_dimension_numbers<[1], [0], [0], [1], [0, 0, 1, 1], [], []>} : vector<8x16xf32>, vector<16x128xf32>, vector<8x128xf32> -> vector<8x128xf32>
    %97 = arith.addf %81, %96 : vector<8x128xf32>
    %cst_46 = arith.constant 0.000000e+00 : f32
    %98 = vector.broadcast %cst_46 : f32 to vector<8x128xf32>
    %99 = arith.maximumf %97, %98 : vector<8x128xf32>
    %100 = arith.addf %99, %9 : vector<8x128xf32>
    %cst_47 = arith.constant 0.000000e+00 : f32
    %101 = vector.broadcast %cst_47 : f32 to vector<8x128xf32>
    %102 = arith.maximumf %100, %101 : vector<8x128xf32>
    %c0_48 = arith.constant 0 : index
    %c0_49 = arith.constant 0 : index
    %103 = vector.load %arg6[%c0_48, %c0_49] : memref<8x128xf32, #tpu.memory_space<vmem>>, vector<8x128xf32>
    tpu.vector_store %arg6[%c0_48, %c0_49], %102 {strides = array<i32>} : memref<8x128xf32, #tpu.memory_space<vmem>>, vector<8x128xf32>,
    return
  }
  func.func @transform_0(%arg0: i32) -> (i32, i32) {
    %c0_i32 = arith.constant 0 : i32
    %c0_i32_0 = arith.constant 0 : i32
    return %c0_i32, %arg0 : i32, i32
  }
  func.func @transform_1(%arg0: i32) -> (i32, i32) {
    %c0_i32 = arith.constant 0 : i32
    %c0_i32_0 = arith.constant 0 : i32
    %c0_i32_1 = arith.constant 0 : i32
    return %c0_i32, %c0_i32_0 : i32, i32
  }
  func.func @transform_2(%arg0: i32) -> (i32, i32) {
    %c0_i32 = arith.constant 0 : i32
    %c0_i32_0 = arith.constant 0 : i32
    %c0_i32_1 = arith.constant 0 : i32
    return %c0_i32, %c0_i32_0 : i32, i32
  }
  func.func @transform_3(%arg0: i32) -> (i32, i32, i32) {
    %c0_i32 = arith.constant 0 : i32
    %c0_i32_0 = arith.constant 0 : i32
    %c0_i32_1 = arith.constant 0 : i32
    %c0_i32_2 = arith.constant 0 : i32
    return %c0_i32, %c0_i32_0, %c0_i32_1 : i32, i32, i32
  }
  func.func @transform_4(%arg0: i32) -> (i32, i32) {
    %c0_i32 = arith.constant 0 : i32
    %c0_i32_0 = arith.constant 0 : i32
    %c0_i32_1 = arith.constant 0 : i32
    return %c0_i32, %c0_i32_0 : i32, i32
  }
  func.func @transform_5(%arg0: i32) -> (i32, i32) {
    %c0_i32 = arith.constant 0 : i32
    %c0_i32_0 = arith.constant 0 : i32
    return %c0_i32, %arg0 : i32, i32
  }
}

</mosaic_0001>

<bundles_post_ra>
// kernel: tpu_custom_call.1
= control target key start
LH: loop header
LB: loop body
LE: loop exit
PB: predicated region body
PF: predicated region fallthrough
CT: control target
= control target key end

     0   :  { %vm43_vm0 = vcmask 64512   ;;  %v346_v3 = vmov 0   ;;  %s434_s0 = inlined_call_operand.vmem [shape: f32[8,128], index: 0, kind: input, shape index: {}]   ;;  %s435_s1 = inlined_call_operand.vmem [shape: f32[24,8], index: 1, kind: input, shape index: {}]   ;;  %s436_s2 = inlined_call_operand.vmem [shape: f32[24,1], index: 2, kind: input, shape index: {}]   ;;  %s437_s3 = inlined_call_operand.vmem [shape: f32[5,8,16], index: 3, kind: input, shape index: {}]   ;;  %s438_s4 = inlined_call_operand.vmem [shape: f32[8,1], index: 4, kind: input, shape index: {}]   ;;  %s439_s5 = inlined_call_operand.hbm [shape: f32[8,128], index: 5, kind: output, shape index: {}]  }
   0x1   :  { %v21_v0 = vld [vmem:[%s434_s0] sm:$0xff]  ;;  %v26_v2 = vld [vmem:[%s436_s2 + $0x8] sm:$0xff]  ;;  %317 = vset.pattern.permute.xlu0 %v346_v3 }
   0x2   :  { %v22_v1 = vld [vmem:[%s435_s1] sm:$0xff]  ;;  %68 = vmatpush.msra.mxu0 %v21_v0 }
   0x3   :  { %10 = vsyncpa [#allocation3], 0  ;;  %291 = vmatmul.msk.f32.vlgmr.msra.gmra.mxu0 %vm43_vm0, %v22_v1  ;;  %35 = vperm.xlu0 %317, %v26_v2   ;;  %v23_v4 = vld [vmem:[%s435_s1 + $0x8] sm:$0xff]  ;;  %v25_v5 = vld [vmem:[%s436_s2] sm:$0xff]  ;;  %s347_s27 = smov 2   ;;  %s348_s28 = smov 126   ;;  %v81_v14 = vlaneseq }
   0x4   :  { %318 = vset.pattern.permute.xlu1 %v346_v3  ;;  %319 = vset.pattern.permute.xlu2 %v346_v3  ;;  %s349_s29 = smov 1   ;;  %s350_s30 = smov 127   ;;  %vm112_vm2 = vcmask 130048   ;;  %v111_v21 = vld [vmem:[%s437_s3] sm:$0xff]  ;;  %v301_v22 = vld [vmem:[%s437_s3 + $0x10] sm:$0xff]  ;;  %v303_v31 = vld [vmem:[%s437_s3 + $0x18] sm:$0xff] }
   0x5   :  { %v82_v15 = vand.u32 127, %v81_v14  ;;  %v24_v24 = vld [vmem:[%s435_s1 + $0x10] sm:$0xff]  ;;  %v95_v25 = vld [vmem:[%s438_s4] sm:$0xff]  ;;  %v297_v34 = vld [vmem:[%s437_s3 + $0x8] sm:$0xff]  ;;  %s351_s19 = smov [#allocation2]   ;;  %s282_s22 = sshll.u32 %s439_s5, 4  ;;  %s283_s22 = int_to_ptr.hbm [resolvable:$true] %s282_s22 }
   0x6   :  { %v27_v26 = vld [vmem:[%s436_s2 + $0x10] sm:$0xff]  ;;  %v307_v36 = vld [vmem:[%s437_s3 + $0x20] sm:$0xff]  ;;  %s280_s3 = sshll.u32 %s351_s19, 4  ;;  %s281_s3 = int_to_ptr.vmem [resolvable:$true] %s280_s3 }
   0x7   :  { %v87_v16 = vand.u32 15, %v82_v15 }
   0x9   :  { %v105_v18 = vadd.s32 4294967294, %v87_v16  ;;  %v203_v20 = vadd.s32 1, %v87_v16  ;;  %v141_v27 = vadd.s32 4294967295, %v87_v16  ;;  %v239_v30 = vadd.s32 2, %v87_v16 }
   0xb   :  { %292 = vmatmul.msk.f32.gmra.mxu0 %vm43_vm0, %v23_v4  ;;  %30 = vperm.xlu0 %317, %v25_v5   ;;  %vm106_vm1 = vcmp.ge.s32.totalorder %v105_v18, 0  ;;  %vm205_vm3 = vcmp.lt.s32.totalorder %v203_v20, 16  ;;  %vm142_vm4 = vcmp.ge.s32.totalorder %v141_v27, 0  ;;  %vm241_vm5 = vcmp.lt.s32.totalorder %v239_v30, 16 }
  0x13   :  { %293 = vmatmul.msk.f32.gmra.mxu0 %vm43_vm0, %v24_v24 }
  0x75   :  { %v36_v6 = vpop.permute.xlu0 %35 }
  0x7d   :  { %v31_v7 = vpop.permute.xlu0 %30 }
  0x80   :  { %v70_v8 = vpop.f32.mrf.mxu0 }
  0x81   :  { %v71_v9 = vadd.f32 %v70_v8, %v31_v7 }
  0x83   :  { %v79_v10 = vmax.f32 %v71_v9, 0.0 }
  0x85   :  { %101 = vrot.lane.b32.xlu2 %v79_v10, %s347_s27 }
  0x88   :  { %v73_v11 = vpop.f32.mrf.mxu0 }
  0x89   :  { %v74_v12 = vadd.f32 %v73_v11, %v36_v6 }
  0x8b   :  { %v80_v13 = vmax.f32 %v74_v12, 0.0 }
  0x8d   :  { %237 = vrot.lane.b32.xlu0 %v80_v13, %s348_s28  ;;  %139 = vrot.lane.b32.xlu1 %v80_v13, %s349_s29 }
  0x8e   :  { %192 = vmatpush.msra.mxu3 %v80_v13  ;;  %103 = vrot.lane.b32.xlu2 %v80_v13, %s347_s27 }
  0x90   :  { %193 = vmatpush.msra.mxu3 %v79_v10  ;;  %v76_v45 = vpop.f32.mrf.mxu0 }
  0x91   :  { %302 = vmatmul.msk.f32.vlgmr.msra.gmra.mxu3 %vm112_vm2, %v301_v22 }
  0x95   :  { %199 = vrot.lane.b32.xlu0 %v79_v10, %s350_s30  ;;  %137 = vrot.lane.b32.xlu1 %v79_v10, %s349_s29 }
  0x96   :  { %201 = vrot.lane.b32.xlu2 %v80_v13, %s350_s30 }
  0x9d   :  { %235 = vrot.lane.b32.xlu1 %v79_v10, %s348_s28 }
  0x9e   :  { %40 = vperm.xlu2 %319, %v27_v26  }
  0xa5   :  { %98 = vperm.xlu1 %318, %v95_v25  }
  0xdf   :  { %v102_v17 = vpop.permute.xlu2 %101 }
  0xe8   :  { %v104_v19 = vpop.permute.xlu2 %103 }
  0xe9   :  { %294 = vmatpush.msk.msra.mxu1 %vm106_vm1, %v104_v19 }
  0xeb   :  { %295 = vmatpush.msk.msra.mxu1 %vm106_vm1, %v102_v17 }
  0xec   :  { %296 = vmatmul.msk.f32.vlgmr.msra.gmra.mxu1 %vm112_vm2, %v111_v21 }
  0xf0   :  { %v202_v23 = vpop.permute.xlu2 %201 }
  0xf1   :  { %304 = vmatpush.msk.msrb.mxu1 %vm205_vm3, %v202_v23 }
  0xf8   :  { %v41_v46 = vpop.permute.xlu2 %40 }
  0xf9   :  { %v77_v50 = vadd.f32 %v76_v45, %v41_v46 }
  0xff   :  { %v238_v28 = vpop.permute.xlu0 %237  ;;  %v140_v29 = vpop.permute.xlu1 %139 }
 0x100   :  { %298 = vmatpush.msk.msra.mxu2 %vm142_vm4, %v140_v29 }
 0x107   :  { %v200_v32 = vpop.permute.xlu0 %199  ;;  %v138_v33 = vpop.permute.xlu1 %137 }
 0x108   :  { %299 = vmatpush.msk.msra.mxu2 %vm142_vm4, %v138_v33  ;;  %305 = vmatpush.msk.msrb.mxu1 %vm205_vm3, %v200_v32 }
 0x109   :  { %306 = vmatmul.msk.f32.vlgmr.msrb.gmra.mxu1 %vm112_vm2, %v303_v31  ;;  %300 = vmatmul.msk.f32.vlgmr.msra.gmra.mxu2 %vm112_vm2, %v297_v34 }
 0x10a   :  { %308 = vmatpush.msk.msrb.mxu2 %vm241_vm5, %v238_v28 }
 0x10f   :  { %v236_v35 = vpop.permute.xlu1 %235 }
 0x110   :  { %309 = vmatpush.msk.msrb.mxu2 %vm241_vm5, %v236_v35 }
 0x111   :  { %310 = vmatmul.msk.f32.vlgmr.msrb.gmra.mxu2 %vm112_vm2, %v307_v36 }
 0x114   :  { %v195_v41 = vpop.f32.mrf.mxu3 }
 0x117   :  { %v99_v38 = vpop.permute.xlu1 %98 }
 0x169   :  { %v133_v37 = vpop.f32.mrf.mxu1 }
 0x16a   :  { %v136_v39 = vadd.f32 %v133_v37, %v99_v38 }
 0x186   :  { %v231_v44 = vpop.f32.mrf.mxu1 }
 0x18c   :  { %v169_v40 = vpop.f32.mrf.mxu2 }
 0x18d   :  { %v172_v42 = vadd.f32 %v169_v40, %v136_v39 }
 0x18f   :  { %v198_v43 = vadd.f32 %v195_v41, %v172_v42 }
 0x191   :  { %v234_v47 = vadd.f32 %v231_v44, %v198_v43 }
 0x194   :  { %v267_v48 = vpop.f32.mrf.mxu2 }
 0x195   :  { %v270_v49 = vadd.f32 %v267_v48, %v234_v47 }
 0x197   :  { %v271_v51 = vmax.f32 %v270_v49, 0.0 }
 0x199   :  { %v272_v52 = vadd.f32 %v271_v51, %v77_v50 }
 0x19b   :  { %v273_v53 = vmax.f32 %v272_v52, 0.0 }
 0x19d   :  { %274 = vst [vmem:[#allocation2] sm:$0xff] %v273_v53 }
 0x19e   :  { %285 = dma.vmem_to_hbm [thread:$0]  %s281_s3, 128, %s283_s22, [#allocation3]  }
 0x19f   :  { %344 = dma.done.wait [#allocation3], 128  }
 0x1a0   :  { %345 = vsyncadd [#allocation3], 4294967168 }
 0x1a1   :  { %290 = vsyncpa [#allocation3], 1 }

</bundles_post_ra>
